<compile_context>
chip_gen: v7x
topology: tpu7x:2x2x1
jax: 0.10.0
libtpu: 0.0.40
codegen_flags: <defaults>
</compile_context>

<pallas_src>
import functools

import jax
import jax.numpy as jnp
from jax.experimental import pallas as pl
from jax.experimental.pallas import tpu as pltpu


def _attention_kernel(x_ref, wq_ref, wk_ref, wv_ref, wout_ref, bout_ref,
                      o_ref, acc_ref, *, heads_per_chunk, dim_head):
    """One (batch_tile, head_chunk) step:
       per-chunk QKV projection -> per-head attention (deferred-normalized
       softmax) -> accumulate this chunk's output-projection contribution."""
    bt, n, c = x_ref.shape
    hc = heads_per_chunk
    d = dim_head
    in_dtype = x_ref.dtype
    h_idx = pl.program_id(1)

    @pl.when(h_idx == 0)
    def _init():
        acc_ref[...] = jnp.zeros_like(acc_ref)

    # Lane-dense activation slab for the projections (contiguous reshape).
    x2 = x_ref[...].reshape(bt * n, c)

    # Per-chunk QKV projections: three lane-aligned dots on the MXU
    # (operands stay in the input dtype, f32 accumulation).  The softmax
    # scale is already folded into w_q by the wrapper.
    q_c = jnp.dot(x2, wq_ref[...], preferred_element_type=jnp.float32)
    k_c = jnp.dot(x2, wk_ref[...], preferred_element_type=jnp.float32)
    v_c = jnp.dot(x2, wv_ref[...], preferred_element_type=jnp.float32)
    q_c = q_c.astype(in_dtype)   # MXU-operand dtype for the attention matmuls
    k_c = k_c.astype(in_dtype)
    v_c = v_c.astype(in_dtype)

    outs = []
    for j in range(hc):          # small static loop over heads in this chunk
        sl = slice(j * d, (j + 1) * d)
        q_j = q_c[:, sl].reshape(bt, n, d)        # (bt, n, d), no transpose
        k_j = k_c[:, sl].reshape(bt, n, d)
        v_j = v_c[:, sl].reshape(bt, n, d)

        # Scores for one head: leading-batch 3-D einsum (single dot_general).
        s = jnp.einsum('bnd,bmd->bnm', q_j, k_j,
                       preferred_element_type=jnp.float32)       # (bt, n, n) f32
        s = s - jnp.max(s, axis=-1, keepdims=True)
        p = jnp.exp(s)                                            # unnormalized
        l = jnp.sum(p, axis=-1, keepdims=True)                    # (bt, n, 1)

        # P @ V first, then normalize: O(n*d) multiply instead of O(n^2).
        o_j = jnp.einsum('bnm,bmd->bnd', p.astype(in_dtype), v_j,
                         preferred_element_type=jnp.float32)      # (bt, n, d) f32
        o_j = o_j * pl.reciprocal(l, approx=False)
        outs.append(o_j)

    # Merge the chunk's heads: concat along lanes + contiguous reshape
    # (no transpose(0, 2, 1, 3) materialization).
    o_c = outs[0] if hc == 1 else jnp.concatenate(outs, axis=-1)  # (bt, n, hc*d)
    o_c = o_c.reshape(bt * n, hc * d).astype(in_dtype)

    # Accumulate this head chunk's contribution to the output projection.
    acc_ref[...] += jnp.dot(o_c, wout_ref[...],
                            preferred_element_type=jnp.float32)

    @pl.when(h_idx == pl.num_programs(1) - 1)
    def _finalize():
        y = acc_ref[...] + bout_ref[...].astype(jnp.float32)
        # Dropout is identity at inference.
        o_ref[...] = y.reshape(bt, n, c).astype(o_ref.dtype)


def _pick_head_chunk(heads, dim_head):
    """Smallest divisor hc of `heads` with (hc*dim_head) % 128 == 0, so the
    per-chunk weight blocks are lane-aligned; fall back to the full inner dim."""
    for hc in range(1, heads + 1):
        if heads % hc == 0 and (hc * dim_head) % 128 == 0:
            return hc
    return heads


def _default_vmem_limit():
    """Per-generation VMEM budget: ~112 MiB on 128-MiB parts (v5e/v6e),
    48 MiB on 64-MiB parts (v7x)."""
    cap = None
    try:
        info = pltpu.get_tpu_info()
        cap = int(getattr(info, "vmem_capacity_bytes", 0)) or None
    except Exception:
        cap = None
    if cap is None:
        cap = 64 * 1024 * 1024          # conservative default (v7x-sized)
    return max(32 * 1024 * 1024,
               min(cap - 16 * 1024 * 1024, 112 * 1024 * 1024))


def _pick_batch_tile(b, n, c, hc, d, dsize, vmem_limit):
    """VMEM-aware batch tile: account for scores/qkv/weight chunks, and cap at
    B//2 so the parallel batch axis keeps >= 2 steps (v7x has 2 TensorCores)."""
    budget = int(0.6 * vmem_limit)
    cap = max(1, b // 2)
    for bt in range(cap, 0, -1):
        if b % bt:
            continue
        m = bt * n
        need = (
            2 * 2 * m * c * dsize                # x + out blocks, double-buffered
            + m * c * 4                          # f32 output-projection accumulator
            + 3 * m * hc * d * (4 + dsize)       # q/k/v chunk (f32 acc + cast copy)
            + 2 * bt * n * n * 4                 # per-head scores + exp (f32, slack)
            + bt * n * d * 4                     # per-head PV output
            + 2 * (4 * c * hc * d + c) * dsize   # weight chunks, double-buffered
        )
        if need <= budget:
            return bt
    return 1


def attention_forward(x, w_qkv, w_out, b_out, *, heads, dim_head,
                      batch_tile=None):
    """x: (B, N, C) -> (B, N, C)."""
    b, n, c = x.shape
    inner = heads * dim_head
    assert w_qkv.shape == (c, 3 * inner)
    assert w_out.shape == (inner, c)
    scale = float(dim_head) ** (-0.5)

    # Split the fused QKV weight once in the wrapper (lane-aligned per-chunk
    # blocks inside the kernel), fold the softmax scale into w_q.
    w_q = (w_qkv[:, :inner].astype(jnp.float32) * scale).astype(w_qkv.dtype)
    w_k = w_qkv[:, inner:2 * inner]
    w_v = w_qkv[:, 2 * inner:]
    b_out2d = b_out.reshape(1, c)

    hc = _pick_head_chunk(heads, dim_head)
    n_chunks = heads // hc
    cd = hc * dim_head

    vmem_limit = _default_vmem_limit()
    dsize = jnp.dtype(x.dtype).itemsize
    if batch_tile is None:
        batch_tile = _pick_batch_tile(b, n, c, hc, dim_head, dsize, vmem_limit)
    bt = batch_tile
    assert b % bt == 0

    kernel = functools.partial(_attention_kernel,
                               heads_per_chunk=hc, dim_head=dim_head)

    return pl.pallas_call(
        kernel,
        out_shape=jax.ShapeDtypeStruct((b, n, c), x.dtype),
        grid_spec=pltpu.PrefetchScalarGridSpec(
            num_scalar_prefetch=0,
            grid=(b // bt, n_chunks),
            in_specs=[
                pl.BlockSpec((bt, n, c), lambda i, h: (i, 0, 0)),  # x (resident over h)
                pl.BlockSpec((c, cd), lambda i, h: (0, h)),        # w_q head chunk
                pl.BlockSpec((c, cd), lambda i, h: (0, h)),        # w_k head chunk
                pl.BlockSpec((c, cd), lambda i, h: (0, h)),        # w_v head chunk
                pl.BlockSpec((cd, c), lambda i, h: (h, 0)),        # w_out head chunk
                pl.BlockSpec((1, c), lambda i, h: (0, 0)),         # b_out
            ],
            out_specs=pl.BlockSpec((bt, n, c), lambda i, h: (i, 0, 0)),
            scratch_shapes=[pltpu.VMEM((bt * n, c), jnp.float32)],
        ),
        compiler_params=pltpu.CompilerParams(
            dimension_semantics=("parallel", "arbitrary"),
            vmem_limit_bytes=int(vmem_limit),
        ),
    )(x, w_q, w_k, w_v, w_out, b_out2d)


def attention_reference(x, w_qkv, w_out, b_out, *, heads, dim_head):
    """Plain-JAX reference mirroring the PyTorch forward."""
    b, n, c = x.shape
    inner = heads * dim_head
    scale = float(dim_head) ** (-0.5)
    qkv = jnp.einsum('bnc,ce->bne', x, w_qkv)
    q, k, v = jnp.split(qkv, 3, axis=-1)

    def to_heads(t):
        return t.reshape(b, n, heads, dim_head).transpose(0, 2, 1, 3)

    q, k, v = map(to_heads, (q, k, v))
    dots = jnp.einsum('bhid,bhjd->bhij', q, k) * scale
    attn = jax.nn.softmax(dots, axis=-1)
    out = jnp.einsum('bhij,bhjd->bhid', attn, v)
    out = out.transpose(0, 2, 1, 3).reshape(b, n, inner)
    return jnp.einsum('bne,ec->bnc', out, w_out) + b_out


if __name__ == "__main__":
    # Small shapes consistent with the module.
    B, N, C = 2, 8, 32            # batch, seq, dim
    HEADS, DIM_HEAD = 4, 8        # inner_dim = 32
    INNER = HEADS * DIM_HEAD

    key = jax.random.PRNGKey(0)
    kx, kqkv, kout, kb = jax.random.split(key, 4)
    x = jax.random.normal(kx, (B, N, C), dtype=jnp.float32)
    w_qkv = jax.random.normal(kqkv, (C, 3 * INNER), dtype=jnp.float32) * 0.05
    w_out = jax.random.normal(kout, (INNER, C), dtype=jnp.float32) * 0.05
    b_out = jax.random.normal(kb, (C,), dtype=jnp.float32) * 0.05

    # f32 path (matches the PyTorch module's default precision).
    y = attention_forward(x, w_qkv, w_out, b_out, heads=HEADS, dim_head=DIM_HEAD)
    y = jax.block_until_ready(y)
    y_ref = attention_reference(x, w_qkv, w_out, b_out,
                                heads=HEADS, dim_head=DIM_HEAD)
    assert y.shape == (B, N, C)
    assert jnp.allclose(y, y_ref, atol=2e-3, rtol=2e-3), "f32 mismatch vs reference"

    # bf16 path: MXU operands stay bf16 (f32 accumulation / f32 softmax).
    xb = x.astype(jnp.bfloat16)
    wqb = w_qkv.astype(jnp.bfloat16)
    wob = w_out.astype(jnp.bfloat16)
    bob = b_out.astype(jnp.bfloat16)
    yb = attention_forward(xb, wqb, wob, bob, heads=HEADS, dim_head=DIM_HEAD)
    yb = jax.block_until_ready(yb)
    yb_ref = attention_reference(xb.astype(jnp.float32), wqb.astype(jnp.float32),
                                 wob.astype(jnp.float32), bob.astype(jnp.float32),
                                 heads=HEADS, dim_head=DIM_HEAD)
    assert jnp.allclose(yb.astype(jnp.float32), yb_ref, atol=5e-2, rtol=5e-2), \
        "bf16 mismatch vs reference"

    print("KERNEL_OK")
</pallas_src>

<mosaic_0001>
module attributes {stable_mosaic.version = 11 : i64} {
  func.func @_attention_kernel(%arg0: i32, %arg1: i32, %arg2: memref<1x8x32xf32, #tpu.memory_space<vmem>>, %arg3: memref<32x32xf32, #tpu.memory_space<vmem>>, %arg4: memref<32x32xf32, #tpu.memory_space<vmem>>, %arg5: memref<32x32xf32, #tpu.memory_space<vmem>>, %arg6: memref<32x32xf32, #tpu.memory_space<vmem>>, %arg7: memref<1x32xf32, #tpu.memory_space<vmem>>, %arg8: memref<1x8x32xf32, #tpu.memory_space<vmem>>, %arg9: memref<8x32xf32, #tpu.memory_space<vmem>>) attributes {dimension_semantics = [#tpu.dimension_semantics<parallel>, #tpu.dimension_semantics<arbitrary>], iteration_bounds = array<i64: 2, 1>, scalar_prefetch = 0 : i64, scratch_operands = 1 : i64, tpu.core_type = #tpu.core_type<tc>, window_params = [{transform_indices = @transform_0, window_bounds = array<i64: 1, 8, 32>}, {transform_indices = @transform_1, window_bounds = array<i64: 32, 32>}, {transform_indices = @transform_2, window_bounds = array<i64: 32, 32>}, {transform_indices = @transform_3, window_bounds = array<i64: 32, 32>}, {transform_indices = @transform_4, window_bounds = array<i64: 32, 32>}, {pipeline_mode = #tpu.pipeline_mode<synchronous>, transform_indices = @transform_5, window_bounds = array<i64: 1, 32>}, {transform_indices = @transform_6, window_bounds = array<i64: 1, 8, 32>}]} {
    %c0_i32 = arith.constant 0 : i32
    %0 = arith.cmpi eq, %arg1, %c0_i32 : i32
    %1 = arith.extui %0 : i1 to i32
    %c0_i32_0 = arith.constant 0 : i32
    %2 = arith.cmpi ne, %1, %c0_i32_0 : i32
    scf.if %2 {
      %cst_36 = arith.constant 0.000000e+00 : f32
      %93 = vector.broadcast %cst_36 : f32 to vector<8x32xf32>
      %c0_37 = arith.constant 0 : index
      %c0_38 = arith.constant 0 : index
      %94 = vector.load %arg9[%c0_37, %c0_38] : memref<8x32xf32, #tpu.memory_space<vmem>>, vector<8x32xf32>
      tpu.vector_store %arg9[%c0_37, %c0_38], %93 {strides = array<i32>} : memref<8x32xf32, #tpu.memory_space<vmem>>, vector<8x32xf32>,
    } else {
    }
    %c0 = arith.constant 0 : index
    %c0_1 = arith.constant 0 : index
    %c0_2 = arith.constant 0 : index
    %3 = vector.load %arg2[%c0, %c0_1, %c0_2] : memref<1x8x32xf32, #tpu.memory_space<vmem>>, vector<1x8x32xf32>
    %4 = vector.shape_cast %3 : vector<1x8x32xf32> to vector<8x32xf32>
    %c0_3 = arith.constant 0 : index
    %c0_4 = arith.constant 0 : index
    %5 = vector.load %arg3[%c0_3, %c0_4] : memref<32x32xf32, #tpu.memory_space<vmem>>, vector<32x32xf32>
    %cst = arith.constant dense<0.000000e+00> : vector<8x32xf32>
    %6 = tpu.matmul %4, %5, %cst {dimension_numbers = #tpu.dot_dimension_numbers<[1], [0], [0], [1], [0, 0, 1, 1], [], []>} : vector<8x32xf32>, vector<32x32xf32>, vector<8x32xf32> -> vector<8x32xf32>
    %c0_5 = arith.constant 0 : index
    %c0_6 = arith.constant 0 : index
    %7 = vector.load %arg4[%c0_5, %c0_6] : memref<32x32xf32, #tpu.memory_space<vmem>>, vector<32x32xf32>
    %cst_7 = arith.constant dense<0.000000e+00> : vector<8x32xf32>
    %8 = tpu.matmul %4, %7, %cst_7 {dimension_numbers = #tpu.dot_dimension_numbers<[1], [0], [0], [1], [0, 0, 1, 1], [], []>} : vector<8x32xf32>, vector<32x32xf32>, vector<8x32xf32> -> vector<8x32xf32>
    %c0_8 = arith.constant 0 : index
    %c0_9 = arith.constant 0 : index
    %9 = vector.load %arg5[%c0_8, %c0_9] : memref<32x32xf32, #tpu.memory_space<vmem>>, vector<32x32xf32>
    %cst_10 = arith.constant dense<0.000000e+00> : vector<8x32xf32>
    %10 = tpu.matmul %4, %9, %cst_10 {dimension_numbers = #tpu.dot_dimension_numbers<[1], [0], [0], [1], [0, 0, 1, 1], [], []>} : vector<8x32xf32>, vector<32x32xf32>, vector<8x32xf32> -> vector<8x32xf32>
    %11 = vector.extract_strided_slice %6 {offsets = [0, 0], sizes = [8, 8], strides = [1, 1]} : vector<8x32xf32> to vector<8x8xf32>
    %12 = vector.shape_cast %11 : vector<8x8xf32> to vector<1x8x8xf32>
    %13 = vector.extract_strided_slice %8 {offsets = [0, 0], sizes = [8, 8], strides = [1, 1]} : vector<8x32xf32> to vector<8x8xf32>
    %14 = vector.shape_cast %13 : vector<8x8xf32> to vector<1x8x8xf32>
    %15 = vector.extract_strided_slice %10 {offsets = [0, 0], sizes = [8, 8], strides = [1, 1]} : vector<8x32xf32> to vector<8x8xf32>
    %16 = vector.shape_cast %15 : vector<8x8xf32> to vector<1x8x8xf32>
    "tpu.trace_start"() <{level = 10 : i32, message = "bnd,bmd->bnm"}> : () -> ()
    %cst_11 = arith.constant dense<0.000000e+00> : vector<1x8x8xf32>
    %17 = tpu.matmul %12, %14, %cst_11 {dimension_numbers = #tpu.dot_dimension_numbers<[2], [2], [1], [1], [0, 0, 0, 1, 1, 1], [0], [0]>} : vector<1x8x8xf32>, vector<1x8x8xf32>, vector<1x8x8xf32> -> vector<1x8x8xf32>
    "tpu.trace_stop"() : () -> ()
    %cst_12 = arith.constant dense<0xFF800000> : vector<1x8xf32>
    %18 = vector.multi_reduction <maximumf>, %17, %cst_12 [2] : vector<1x8x8xf32> to vector<1x8xf32>
    %19 = vector.shape_cast %18 : vector<1x8xf32> to vector<1x8x1xf32>
    %20 = vector.broadcast %19 : vector<1x8x1xf32> to vector<1x8x8xf32>
    %21 = arith.subf %17, %20 : vector<1x8x8xf32>
    %22 = math.exp %21 : vector<1x8x8xf32>
    %cst_13 = arith.constant dense<0.000000e+00> : vector<1x8xf32>
    %23 = vector.multi_reduction <add>, %22, %cst_13 [2] : vector<1x8x8xf32> to vector<1x8xf32>
    %24 = vector.shape_cast %23 : vector<1x8xf32> to vector<1x8x1xf32>
    "tpu.trace_start"() <{level = 10 : i32, message = "bnm,bmd->bnd"}> : () -> ()
    %cst_14 = arith.constant dense<0.000000e+00> : vector<1x8x8xf32>
    %25 = tpu.matmul %22, %16, %cst_14 {dimension_numbers = #tpu.dot_dimension_numbers<[2], [1], [1], [2], [0, 0, 0, 1, 1, 2], [0], [0]>} : vector<1x8x8xf32>, vector<1x8x8xf32>, vector<1x8x8xf32> -> vector<1x8x8xf32>
    "tpu.trace_stop"() : () -> ()
    %26 = tpu.reciprocal %24 : vector<1x8x1xf32> -> vector<1x8x1xf32>
    %27 = vector.broadcast %26 : vector<1x8x1xf32> to vector<1x8x8xf32>
    %28 = arith.mulf %25, %27 : vector<1x8x8xf32>
    %29 = vector.extract_strided_slice %6 {offsets = [0, 8], sizes = [8, 8], strides = [1, 1]} : vector<8x32xf32> to vector<8x8xf32>
    %30 = vector.shape_cast %29 : vector<8x8xf32> to vector<1x8x8xf32>
    %31 = vector.extract_strided_slice %8 {offsets = [0, 8], sizes = [8, 8], strides = [1, 1]} : vector<8x32xf32> to vector<8x8xf32>
    %32 = vector.shape_cast %31 : vector<8x8xf32> to vector<1x8x8xf32>
    %33 = vector.extract_strided_slice %10 {offsets = [0, 8], sizes = [8, 8], strides = [1, 1]} : vector<8x32xf32> to vector<8x8xf32>
    %34 = vector.shape_cast %33 : vector<8x8xf32> to vector<1x8x8xf32>
    "tpu.trace_start"() <{level = 10 : i32, message = "bnd,bmd->bnm"}> : () -> ()
    %cst_15 = arith.constant dense<0.000000e+00> : vector<1x8x8xf32>
    %35 = tpu.matmul %30, %32, %cst_15 {dimension_numbers = #tpu.dot_dimension_numbers<[2], [2], [1], [1], [0, 0, 0, 1, 1, 1], [0], [0]>} : vector<1x8x8xf32>, vector<1x8x8xf32>, vector<1x8x8xf32> -> vector<1x8x8xf32>
    "tpu.trace_stop"() : () -> ()
    %cst_16 = arith.constant dense<0xFF800000> : vector<1x8xf32>
    %36 = vector.multi_reduction <maximumf>, %35, %cst_16 [2] : vector<1x8x8xf32> to vector<1x8xf32>
    %37 = vector.shape_cast %36 : vector<1x8xf32> to vector<1x8x1xf32>
    %38 = vector.broadcast %37 : vector<1x8x1xf32> to vector<1x8x8xf32>
    %39 = arith.subf %35, %38 : vector<1x8x8xf32>
    %40 = math.exp %39 : vector<1x8x8xf32>
    %cst_17 = arith.constant dense<0.000000e+00> : vector<1x8xf32>
    %41 = vector.multi_reduction <add>, %40, %cst_17 [2] : vector<1x8x8xf32> to vector<1x8xf32>
    %42 = vector.shape_cast %41 : vector<1x8xf32> to vector<1x8x1xf32>
    "tpu.trace_start"() <{level = 10 : i32, message = "bnm,bmd->bnd"}> : () -> ()
    %cst_18 = arith.constant dense<0.000000e+00> : vector<1x8x8xf32>
    %43 = tpu.matmul %40, %34, %cst_18 {dimension_numbers = #tpu.dot_dimension_numbers<[2], [1], [1], [2], [0, 0, 0, 1, 1, 2], [0], [0]>} : vector<1x8x8xf32>, vector<1x8x8xf32>, vector<1x8x8xf32> -> vector<1x8x8xf32>
    "tpu.trace_stop"() : () -> ()
    %44 = tpu.reciprocal %42 : vector<1x8x1xf32> -> vector<1x8x1xf32>
    %45 = vector.broadcast %44 : vector<1x8x1xf32> to vector<1x8x8xf32>
    %46 = arith.mulf %43, %45 : vector<1x8x8xf32>
    %47 = vector.extract_strided_slice %6 {offsets = [0, 16], sizes = [8, 8], strides = [1, 1]} : vector<8x32xf32> to vector<8x8xf32>
    %48 = vector.shape_cast %47 : vector<8x8xf32> to vector<1x8x8xf32>
    %49 = vector.extract_strided_slice %8 {offsets = [0, 16], sizes = [8, 8], strides = [1, 1]} : vector<8x32xf32> to vector<8x8xf32>
    %50 = vector.shape_cast %49 : vector<8x8xf32> to vector<1x8x8xf32>
    %51 = vector.extract_strided_slice %10 {offsets = [0, 16], sizes = [8, 8], strides = [1, 1]} : vector<8x32xf32> to vector<8x8xf32>
    %52 = vector.shape_cast %51 : vector<8x8xf32> to vector<1x8x8xf32>
    "tpu.trace_start"() <{level = 10 : i32, message = "bnd,bmd->bnm"}> : () -> ()
    %cst_19 = arith.constant dense<0.000000e+00> : vector<1x8x8xf32>
    %53 = tpu.matmul %48, %50, %cst_19 {dimension_numbers = #tpu.dot_dimension_numbers<[2], [2], [1], [1], [0, 0, 0, 1, 1, 1], [0], [0]>} : vector<1x8x8xf32>, vector<1x8x8xf32>, vector<1x8x8xf32> -> vector<1x8x8xf32>
    "tpu.trace_stop"() : () -> ()
    %cst_20 = arith.constant dense<0xFF800000> : vector<1x8xf32>
    %54 = vector.multi_reduction <maximumf>, %53, %cst_20 [2] : vector<1x8x8xf32> to vector<1x8xf32>
    %55 = vector.shape_cast %54 : vector<1x8xf32> to vector<1x8x1xf32>
    %56 = vector.broadcast %55 : vector<1x8x1xf32> to vector<1x8x8xf32>
    %57 = arith.subf %53, %56 : vector<1x8x8xf32>
    %58 = math.exp %57 : vector<1x8x8xf32>
    %cst_21 = arith.constant dense<0.000000e+00> : vector<1x8xf32>
    %59 = vector.multi_reduction <add>, %58, %cst_21 [2] : vector<1x8x8xf32> to vector<1x8xf32>
    %60 = vector.shape_cast %59 : vector<1x8xf32> to vector<1x8x1xf32>
    "tpu.trace_start"() <{level = 10 : i32, message = "bnm,bmd->bnd"}> : () -> ()
    %cst_22 = arith.constant dense<0.000000e+00> : vector<1x8x8xf32>
    %61 = tpu.matmul %58, %52, %cst_22 {dimension_numbers = #tpu.dot_dimension_numbers<[2], [1], [1], [2], [0, 0, 0, 1, 1, 2], [0], [0]>} : vector<1x8x8xf32>, vector<1x8x8xf32>, vector<1x8x8xf32> -> vector<1x8x8xf32>
    "tpu.trace_stop"() : () -> ()
    %62 = tpu.reciprocal %60 : vector<1x8x1xf32> -> vector<1x8x1xf32>
    %63 = vector.broadcast %62 : vector<1x8x1xf32> to vector<1x8x8xf32>
    %64 = arith.mulf %61, %63 : vector<1x8x8xf32>
    %65 = vector.extract_strided_slice %6 {offsets = [0, 24], sizes = [8, 8], strides = [1, 1]} : vector<8x32xf32> to vector<8x8xf32>
    %66 = vector.shape_cast %65 : vector<8x8xf32> to vector<1x8x8xf32>
    %67 = vector.extract_strided_slice %8 {offsets = [0, 24], sizes = [8, 8], strides = [1, 1]} : vector<8x32xf32> to vector<8x8xf32>
    %68 = vector.shape_cast %67 : vector<8x8xf32> to vector<1x8x8xf32>
    %69 = vector.extract_strided_slice %10 {offsets = [0, 24], sizes = [8, 8], strides = [1, 1]} : vector<8x32xf32> to vector<8x8xf32>
    %70 = vector.shape_cast %69 : vector<8x8xf32> to vector<1x8x8xf32>
    "tpu.trace_start"() <{level = 10 : i32, message = "bnd,bmd->bnm"}> : () -> ()
    %cst_23 = arith.constant dense<0.000000e+00> : vector<1x8x8xf32>
    %71 = tpu.matmul %66, %68, %cst_23 {dimension_numbers = #tpu.dot_dimension_numbers<[2], [2], [1], [1], [0, 0, 0, 1, 1, 1], [0], [0]>} : vector<1x8x8xf32>, vector<1x8x8xf32>, vector<1x8x8xf32> -> vector<1x8x8xf32>
    "tpu.trace_stop"() : () -> ()
    %cst_24 = arith.constant dense<0xFF800000> : vector<1x8xf32>
    %72 = vector.multi_reduction <maximumf>, %71, %cst_24 [2] : vector<1x8x8xf32> to vector<1x8xf32>
    %73 = vector.shape_cast %72 : vector<1x8xf32> to vector<1x8x1xf32>
    %74 = vector.broadcast %73 : vector<1x8x1xf32> to vector<1x8x8xf32>
    %75 = arith.subf %71, %74 : vector<1x8x8xf32>
    %76 = math.exp %75 : vector<1x8x8xf32>
    %cst_25 = arith.constant dense<0.000000e+00> : vector<1x8xf32>
    %77 = vector.multi_reduction <add>, %76, %cst_25 [2] : vector<1x8x8xf32> to vector<1x8xf32>
    %78 = vector.shape_cast %77 : vector<1x8xf32> to vector<1x8x1xf32>
    "tpu.trace_start"() <{level = 10 : i32, message = "bnm,bmd->bnd"}> : () -> ()
    %cst_26 = arith.constant dense<0.000000e+00> : vector<1x8x8xf32>
    %79 = tpu.matmul %76, %70, %cst_26 {dimension_numbers = #tpu.dot_dimension_numbers<[2], [1], [1], [2], [0, 0, 0, 1, 1, 2], [0], [0]>} : vector<1x8x8xf32>, vector<1x8x8xf32>, vector<1x8x8xf32> -> vector<1x8x8xf32>
    "tpu.trace_stop"() : () -> ()
    %80 = tpu.reciprocal %78 : vector<1x8x1xf32> -> vector<1x8x1xf32>
    %81 = vector.broadcast %80 : vector<1x8x1xf32> to vector<1x8x8xf32>
    %82 = arith.mulf %79, %81 : vector<1x8x8xf32>
    %83 = tpu.concatenate %28, %46, %64, %82 in 2 : vector<1x8x8xf32>, vector<1x8x8xf32>, vector<1x8x8xf32>, vector<1x8x8xf32> -> vector<1x8x32xf32>
    %84 = vector.shape_cast %83 : vector<1x8x32xf32> to vector<8x32xf32>
    %c0_27 = arith.constant 0 : index
    %c0_28 = arith.constant 0 : index
    %85 = vector.load %arg9[%c0_27, %c0_28] : memref<8x32xf32, #tpu.memory_space<vmem>>, vector<8x32xf32>
    %c0_29 = arith.constant 0 : index
    %c0_30 = arith.constant 0 : index
    %86 = vector.load %arg6[%c0_29, %c0_30] : memref<32x32xf32, #tpu.memory_space<vmem>>, vector<32x32xf32>
    %cst_31 = arith.constant dense<0.000000e+00> : vector<8x32xf32>
    %87 = tpu.matmul %84, %86, %cst_31 {dimension_numbers = #tpu.dot_dimension_numbers<[1], [0], [0], [1], [0, 0, 1, 1], [], []>} : vector<8x32xf32>, vector<32x32xf32>, vector<8x32xf32> -> vector<8x32xf32>
    %88 = arith.addf %85, %87 : vector<8x32xf32>
    %c0_32 = arith.constant 0 : index
    %c0_33 = arith.constant 0 : index
    %89 = vector.load %arg9[%c0_32, %c0_33] : memref<8x32xf32, #tpu.memory_space<vmem>>, vector<8x32xf32>
    tpu.vector_store %arg9[%c0_32, %c0_33], %88 {strides = array<i32>} : memref<8x32xf32, #tpu.memory_space<vmem>>, vector<8x32xf32>,
    %c0_i32_34 = arith.constant 0 : i32
    %90 = arith.cmpi eq, %arg1, %c0_i32_34 : i32
    %91 = arith.extui %90 : i1 to i32
    %c0_i32_35 = arith.constant 0 : i32
    %92 = arith.cmpi ne, %91, %c0_i32_35 : i32
    scf.if %92 {
      %c0_36 = arith.constant 0 : index
      %c0_37 = arith.constant 0 : index
      %93 = vector.load %arg9[%c0_36, %c0_37] : memref<8x32xf32, #tpu.memory_space<vmem>>, vector<8x32xf32>
      %c0_38 = arith.constant 0 : index
      %c0_39 = arith.constant 0 : index
      %94 = vector.load %arg7[%c0_38, %c0_39] : memref<1x32xf32, #tpu.memory_space<vmem>>, vector<1x32xf32>
      %95 = vector.broadcast %94 : vector<1x32xf32> to vector<8x32xf32>
      %96 = arith.addf %93, %95 : vector<8x32xf32>
      %97 = vector.shape_cast %96 : vector<8x32xf32> to vector<1x8x32xf32>
      %c0_40 = arith.constant 0 : index
      %c0_41 = arith.constant 0 : index
      %c0_42 = arith.constant 0 : index
      %98 = vector.load %arg8[%c0_40, %c0_41, %c0_42] : memref<1x8x32xf32, #tpu.memory_space<vmem>>, vector<1x8x32xf32>
      tpu.vector_store %arg8[%c0_40, %c0_41, %c0_42], %97 {strides = array<i32>} : memref<1x8x32xf32, #tpu.memory_space<vmem>>, vector<1x8x32xf32>,
    } else {
    }
    return
  }
  func.func @transform_0(%arg0: i32, %arg1: i32) -> (i32, i32, i32) {
    %c0_i32 = arith.constant 0 : i32
    %c0_i32_0 = arith.constant 0 : i32
    %c0_i32_1 = arith.constant 0 : i32
    return %arg0, %c0_i32, %c0_i32_0 : i32, i32, i32
  }
  func.func @transform_1(%arg0: i32, %arg1: i32) -> (i32, i32) {
    %c0_i32 = arith.constant 0 : i32
    %c0_i32_0 = arith.constant 0 : i32
    return %c0_i32, %arg1 : i32, i32
  }
  func.func @transform_2(%arg0: i32, %arg1: i32) -> (i32, i32) {
    %c0_i32 = arith.constant 0 : i32
    %c0_i32_0 = arith.constant 0 : i32
    return %c0_i32, %arg1 : i32, i32
  }
  func.func @transform_3(%arg0: i32, %arg1: i32) -> (i32, i32) {
    %c0_i32 = arith.constant 0 : i32
    %c0_i32_0 = arith.constant 0 : i32
    return %c0_i32, %arg1 : i32, i32
  }
  func.func @transform_4(%arg0: i32, %arg1: i32) -> (i32, i32) {
    %c0_i32 = arith.constant 0 : i32
    %c0_i32_0 = arith.constant 0 : i32
    return %arg1, %c0_i32 : i32, i32
  }
  func.func @transform_5(%arg0: i32, %arg1: i32) -> (i32, i32) {
    %c0_i32 = arith.constant 0 : i32
    %c0_i32_0 = arith.constant 0 : i32
    %c0_i32_1 = arith.constant 0 : i32
    return %c0_i32, %c0_i32_0 : i32, i32
  }
  func.func @transform_6(%arg0: i32, %arg1: i32) -> (i32, i32, i32) {
    %c0_i32 = arith.constant 0 : i32
    %c0_i32_0 = arith.constant 0 : i32
    %c0_i32_1 = arith.constant 0 : i32
    return %arg0, %c0_i32, %c0_i32_0 : i32, i32, i32
  }
}

</mosaic_0001>

<bundles_post_ra>
// kernel: tpu_custom_call.1
= control target key start
LH: loop header
LB: loop body
LE: loop exit
PB: predicated region body
PF: predicated region fallthrough
CT: control target
= control target key end

     0   :  { %s2498_s0 = inlined_call_operand.hbm [shape: f32[2,8,32], index: 0, kind: input, shape index: {}]   ;;  %s2499_s1 = inlined_call_operand.hbm [shape: f32[32,32], index: 1, kind: input, shape index: {}]   ;;  %s2500_s2 = inlined_call_operand.hbm [shape: f32[32,32], index: 2, kind: input, shape index: {}]   ;;  %s2501_s3 = inlined_call_operand.hbm [shape: f32[32,32], index: 3, kind: input, shape index: {}]   ;;  %s2502_s4 = inlined_call_operand.hbm [shape: f32[32,32], index: 4, kind: input, shape index: {}]   ;;  %s2503_s5 = inlined_call_operand.vmem [shape: f32[1,32], index: 5, kind: input, shape index: {}]   ;;  %s2504_s6 = inlined_call_operand.hbm [shape: f32[2,8,32], index: 6, kind: output, shape index: {}]  }
   0x1   :  { %2510 = sst [smem:[#allocation17_spill]] %s2499_s1 }
   0x2   :  { %11 = vsyncpa [#allocation4], 0 }
   0x3   :  { %13 = vsyncpa [#allocation4 + $0x1], 0 }
   0x4   :  { %14 = vsyncpa [#allocation7], 0 }
   0x5   :  { %15 = vsyncpa [#allocation10], 0 }
   0x6   :  { %16 = vsyncpa [#allocation5], 0 }
   0x7   :  { %18 = vsyncpa [#allocation5 + $0x1], 0  ;;  %s2103_s21 = smov 0   ;;  %s2105_s22 = smov 0  }
   0x8   :  { %s2107_s23 = smov 0   ;;  %s2109_s24 = smov 0  }
   0x9   :  { %s2111_s25 = smov 0   ;;  %s2113_s26 = smov 0  }
   0xa LB: > { %s2505_s27 = sadd.s32 4294967295, %s2049_s26   ;;  %p1507_p0 = scmp.ge.s32.totalorder %s2049_s26, 1  ;;  %s2049_s26 = sphi %s2113_s26, %s24_s26   ;;  %s2045_s25 = sphi %s2111_s25, %s2532_s25   ;;  %s2041_s24 = sphi %s2109_s24, %s2531_s24   ;;  %s2037_s23 = sphi %s2107_s23, %s2530_s23   ;;  %s2033_s22 = sphi %s2105_s22, %s2529_s22   ;;  %s2029_s21 = sphi %s2103_s21, %s2528_s21  }
   0xb   : > { %p2137_p1 = scmp.eq.s32.totalorder %s2505_s27, 0  ;;  %p218_p2 = scmp.lt.s32.totalorder %s2049_s26, 3 }
   0xc   : > { %s2051_s30 = smov [#allocation6]   ;;  %s2052_s9 = smov [#allocation9]  }
   0xd   : > { %s2511_s28 = scalar_select %p2137_p1, 1, 0 }
   0xe   : > { %p2142_p3 = pnand %p1507_p0, %p218_p2  ;;  %s232_s7 = sshll.u32 %s2051_s30, 4  ;;  %s2146_s7 = int_to_ptr.vmem [resolvable:$true] %s232_s7 }
   0xf   : > { %s262_s10 = sshll.u32 %s2052_s9, 4  ;;  %s2053_s11 = smov [#allocation8]   ;;  %s2157_s10 = int_to_ptr.vmem [resolvable:$true] %s262_s10 }
  0x10   : > { %s2512_s29 = scalar_select %p2142_p3, 1, 0 }
  0x11   : > { %p1707_p4 = pneg %p2142_p3  ;;  %s2159_s12 = sshll.u32 %s2053_s11, 4  ;;  %s248_s12 = int_to_ptr.vmem [resolvable:$true] %s2159_s12 }
  0x12   : > { %s2514_s1 = sld [smem:[#allocation17_spill]] }
  0x13   : > { %p2153_p6 = pnand %p1707_p4, %p2137_p1 }
  0x15   : > { %p2169_p8 = pneg %p2153_p6 }
  0x18   : > { %s1817_s15 = scalar_lea.hbm %s2514_s1, 512 }
  0x19   : > { %p1818_p7 = scmp.ne.s32.totalorder %s2514_s1, %s1817_s15  ;;  %p1824_p11 = scmp.lt.u32.totalorder %s1817_s15, %s2514_s1 }
  0x1b   : > { %p1820_p9 = pnand %p2169_p8, %p1818_p7 }
  0x1d   : > { %p1821_p10 = pneg %p1820_p9 }
  0x1f   : > { %p1826_p12 = pnand %p1824_p11, %p1821_p10 }
  0x21   : > { %1829 = shalt.err (!%p1826_p12)
}
  0x22   : > { %s1830_s30 = scalar_lea.vmem %s2146_s7, 512  ;;  %p1838_p4 = scmp.lt.s32.totalorder %s2146_s7, %s2146_s7 }
  0x23   : > { %p1831_p13 = scmp.ne.s32.totalorder %s2146_s7, %s1830_s30  ;;  %p1839_p5 = scmp.lt.s32.totalorder %s1830_s30, %s1830_s30 }
  0x25   : > { %p1833_p0 = pnand %p1831_p13, %p2169_p8  ;;  %p1840_p7 = por %p1839_p5, %p1838_p4 }
  0x27   : > { %p1834_p2 = pneg %p1833_p0 }
  0x29   : > { %p1841_p9 = pnand %p1840_p7, %p1834_p2 }
  0x2b   : > { %1844 = shalt.err (!%p1841_p9)
}
  0x2c   : > { %s2054_s9 = smov 128   ;;  %s2055_s11 = smov 8  }
  0x2d   : > { %1710 = dma.hbm_to_vmem [thread:$0]  (!%p2153_p6), %s2514_s1, 512, %s2146_s7, [#allocation7], %s2054_s9, %s2054_s9, %s2055_s11  }
  0x2e   : > { %s1845_s17 = scalar_lea.hbm %s2501_s3, 512 }
  0x2f   : > { %p1846_p5 = scmp.ne.s32.totalorder %s2501_s3, %s1845_s17  ;;  %p1852_p12 = scmp.lt.u32.totalorder %s1845_s17, %s2501_s3 }
  0x31   : > { %p1848_p10 = pnand %p1846_p5, %p2169_p8 }
  0x33   : > { %p1849_p11 = pneg %p1848_p10 }
  0x35   : > { %p1854_p13 = pnand %p1852_p12, %p1849_p11 }
  0x37   : > { %1857 = shalt.err (!%p1854_p13)
}
  0x38   : > { %s1858_s7 = scalar_lea.vmem %s2157_s10, 512  ;;  %p1866_p7 = scmp.lt.s32.totalorder %s2157_s10, %s2157_s10 }
  0x39   : > { %p1859_p0 = scmp.ne.s32.totalorder %s2157_s10, %s1858_s7  ;;  %p1867_p9 = scmp.lt.s32.totalorder %s1858_s7, %s1858_s7 }
  0x3b   : > { %p1861_p2 = pnand %p1859_p0, %p2169_p8  ;;  %p1868_p5 = por %p1867_p9, %p1866_p7 }
  0x3d   : > { %p1862_p4 = pneg %p1861_p2 }
  0x3f   : > { %p1869_p10 = pnand %p1868_p5, %p1862_p4 }
  0x41   : > { %1872 = shalt.err (!%p1869_p10)
}
  0x42   : > { %1716 = dma.hbm_to_vmem [thread:$0]  (!%p2153_p6), %s2501_s3, 512, %s2157_s10, [#allocation10], %s2054_s9, %s2054_s9, %s2055_s11  }
  0x43   : > { %s1873_s16 = scalar_lea.hbm %s2500_s2, 512 }
  0x44   : > { %p1874_p11 = scmp.ne.s32.totalorder %s2500_s2, %s1873_s16  ;;  %p1880_p0 = scmp.lt.u32.totalorder %s1873_s16, %s2500_s2 }
  0x46   : > { %p1876_p12 = pnand %p1874_p11, %p2169_p8 }
  0x48   : > { %p1877_p13 = pneg %p1876_p12 }
  0x4a   : > { %p1882_p2 = pnand %p1880_p0, %p1877_p13 }
  0x4c   : > { %1885 = shalt.err (!%p1882_p2)
}
  0x4d   : > { %s1886_s7 = scalar_lea.vmem %s248_s12, 512  ;;  %p1894_p5 = scmp.lt.s32.totalorder %s248_s12, %s248_s12 }
  0x4e   : > { %p1887_p4 = scmp.ne.s32.totalorder %s248_s12, %s1886_s7  ;;  %p1895_p10 = scmp.lt.s32.totalorder %s1886_s7, %s1886_s7 }
  0x50   : > { %p1889_p7 = pnand %p1887_p4, %p2169_p8  ;;  %p1896_p3 = por %p1895_p10, %p1894_p5 }
  0x52   : > { %p1890_p9 = pneg %p1889_p7 }
  0x54   : > { %p1897_p1 = pnand %p1896_p3, %p1890_p9 }
  0x56   : > { %1900 = shalt.err (!%p1897_p1)
}
  0x57   : > { %1713 = dma.hbm_to_vmem [thread:$0]  (!%p2153_p6), %s2500_s2, 512, %s248_s12, [#allocation7], %s2054_s9, %s2054_s9, %s2055_s11  }
  0x58   : > { %s2056_s13 = smov [#allocation11]   ;;  %s1901_s17 = scalar_lea.hbm %s2502_s4, 512 }
  0x59   : > { %s278_s14 = sshll.u32 %s2056_s13, 4  ;;  %p1902_p1 = scmp.ne.s32.totalorder %s2502_s4, %s1901_s17  ;;  %s279_s14 = int_to_ptr.vmem [resolvable:$true] %s278_s14 }
  0x5a   : > { %p1908_p12 = scmp.lt.u32.totalorder %s1901_s17, %s2502_s4 }
  0x5b   : > { %p1904_p3 = pnand %p1902_p1, %p2169_p8 }
  0x5d   : > { %p1905_p11 = pneg %p1904_p3 }
  0x5f   : > { %p1910_p13 = pnand %p1908_p12, %p1905_p11 }
  0x61   : > { %1913 = shalt.err (!%p1910_p13)
}
  0x62   : > { %s1914_s12 = scalar_lea.vmem %s279_s14, 512  ;;  %p1922_p7 = scmp.lt.s32.totalorder %s279_s14, %s279_s14 }
  0x63   : > { %p1915_p0 = scmp.ne.s32.totalorder %s279_s14, %s1914_s12  ;;  %p1923_p9 = scmp.lt.s32.totalorder %s1914_s12, %s1914_s12 }
  0x65   : > { %p1917_p2 = pnand %p1915_p0, %p2169_p8  ;;  %p1924_p5 = por %p1923_p9, %p1922_p7 }
  0x67   : > { %p1918_p4 = pneg %p1917_p2 }
  0x69   : > { %p1925_p10 = pnand %p1924_p5, %p1918_p4 }
  0x6b   : > { %1928 = shalt.err (!%p1925_p10)
}
  0x6c   : > { %1719 = dma.hbm_to_vmem [thread:$0]  (!%p2153_p6), %s2502_s4, 512, %s279_s14, [#allocation10], %s2054_s9, %s2054_s9, %s2055_s11  }
  0x6d   : > { %s1506_s8 = sadd.s32 4294967294, %s2049_s26   ;;  %s36_s18 = sadd.s32 1, %s2045_s25 }
  0x6e   : > { %p38_p8 = scmp.ge.s32.totalorder %s36_s18, 2  ;;  %s43_s13 = sadd.s32 1, %s2037_s23 }
  0x6f   : > { %p50_p1 = scmp.ne.s32.totalorder %s2037_s23, %s2033_s22  ;;  %p51_p3 = scmp.eq.s32.totalorder %s2049_s26, 0 }
  0x70   : > { %s2534_s18 = smov (%p38_p8, %s36_s18), 0  ;;  %p56_p12 = scmp.ne.s32.totalorder %s2033_s22, %s2029_s21 }
  0x71   : > { %p2270_p11 = por %p51_p3, %p50_p1  ;;  %s40_s9 = ssub.s32 %s2045_s25, %s2534_s18 }
  0x72   : > { %s2517_s11 = sadd.s32 4294967295, %s2049_s26   ;;  %p41_p13 = scmp.eq.s32.totalorder %s40_s9, 0 }
  0x73   : > { %p205_p6 = scmp.eq.s32.totalorder %s2517_s11, 1  ;;  %p2518_p0 = scmp.ne.s32.totalorder %s2511_s28, 0 }
  0x74   : > { %p211_p7 = scmp.eq.s32.totalorder %s1506_s8, 1  ;;  %p1732_p5 = scmp.lt.s32.totalorder %s2049_s26, 2 }
  0x75   : > { %p2282_p2 = por %p2518_p0, %p56_p12  ;;  %p2286_p4 = por %p205_p6, %p50_p1 }
  0x76   : > { %s2291_s17 = scalar_select %p41_p13, %s2037_s23, %s43_s13  }
  0x77   : > { %s2520_s16 = scalar_select %p2286_p4, 1, 0 }
  0x78   : > { %p2293_p9 = por %p211_p7, %p56_p12  ;;  %s295_s20 = sand.u32 1, %s2037_s23  }
  0x79   : > { %s1514_s30 = sshll.u32 %s2045_s25, 7  ;;  %s1513_s7 = sshll.u32 %s295_s20, 3 }
  0x7a   : > { %s2521_s19 = scalar_select %p2293_p9, 1, 0 }
  0x7b   : > { %s2303_s27 = scalar_lea.hbm %s2498_s0, %s1514_s30  ;;  %s299_s8 = scalar_lea.vmem [#allocation3], %s1513_s7 }
  0x7c   : > { %s306_s13 = sshll.u32 %s299_s8, 4  ;;  %p2307_p10 = pnand %p1732_p5, %p2270_p11  ;;  %s2311_s13 = int_to_ptr.vmem [resolvable:$true] %s306_s13 }
  0x7d   : > { %s296_s11 = scalar_lea.sflag [#allocation4], %s295_s20  ;;  %s1929_s1 = scalar_lea.hbm %s2303_s27, 128 }
  0x7e   : > { %p1930_p8 = scmp.ne.s32.totalorder %s2303_s27, %s1929_s1  ;;  %p1931_p1 = pneg %p2307_p10 }
  0x7f   : > { %s1934_s15 = scalar_lea.hbm %s2498_s0, 256  ;;  %p1935_p11 = scmp.lt.u32.totalorder %s2303_s27, %s2498_s0 }
  0x80   : > { %p1932_p3 = pnand %p1931_p1, %p1930_p8  ;;  %p1936_p6 = scmp.lt.u32.totalorder %s1934_s15, %s1929_s1 }
  0x81   : > { %p1938_p0 = scmp.lt.u32.totalorder %s1929_s1, %s2303_s27 }
  0x82   : > { %p1933_p12 = pneg %p1932_p3  ;;  %p1937_p13 = por %p1936_p6, %p1935_p11 }
  0x84   : > { %p1939_p7 = por %p1938_p0, %p1937_p13 }
  0x86   : > { %p1940_p5 = pnand %p1939_p7, %p1933_p12 }
  0x88   : > { %1943 = shalt.err (!%p1940_p5)
}
  0x89   : > { %s1944_s20 = scalar_lea.vmem %s2311_s13, 128  ;;  %s2057_s8 = smov [#allocation3]  }
  0x8a   : > { %p1945_p8 = scmp.ne.s32.totalorder %s2311_s13, %s1944_s20  ;;  %s1949_s30 = sshll.u32 %s2057_s8, 4  ;;  %s1950_s30 = int_to_ptr.vmem [resolvable:$false] %s1949_s30 }
  0x8b   : > { %s1951_s7 = scalar_lea.vmem %s1950_s30, 256  ;;  %p1952_p4 = scmp.lt.s32.totalorder %s2311_s13, %s1950_s30 }
  0x8c   : > { %p1947_p3 = pnand %p1945_p8, %p1931_p1  ;;  %p1953_p11 = scmp.lt.s32.totalorder %s1951_s7, %s1944_s20 }
  0x8e   : > { %p1948_p9 = pneg %p1947_p3  ;;  %p1954_p6 = por %p1953_p11, %p1952_p4 }
  0x90   : > { %p1955_p13 = pnand %p1954_p6, %p1948_p9 }
  0x92   : > { %1958 = shalt.err (!%p1955_p13)
}
  0x93   : > { %1723 = dma.hbm_to_vmem [thread:$0]  (!%p2307_p10), %s2303_s27, 128, %s2311_s13, %s296_s11  }
  0x94   : > { %p2523_p12 = scmp.ne.s32.totalorder %s2512_s29, 0 }
  0x95   : > { %s2341_s1 = sand.u32 (!%p2523_p12), 1, %s2033_s22  }
  0x96   : > { %315 = sbr.rel (%p2523_p12) target bundleno = 1710 (0x6ae), region = 44  ;;  %s1516_s15 = sshll.u32 (!%p2523_p12), %s2341_s1, 3 }
  0x97   : > { %s318_s12 = scalar_lea.sflag (!%p2523_p12), [#allocation4], %s2341_s1  ;;  %s2347_s10 = scalar_lea.vmem (!%p2523_p12), [#allocation3], %s1516_s15 }
  0x9d   : > { %2012 = dma.done.wait (%p2282_p2), %s318_s12, 128  }
  0x9e   : > { %2014 = vsyncadd (%p2282_p2), %s318_s12, 4294967168  ;;  %p2524_p4 = scmp.ne.s32.totalorder %s2511_s28, 0 }
  0xa0   : > { %2016 = dma.done.wait (%p2524_p4), [#allocation7], 1024  }
  0xa1   : > { %2018 = vsyncadd (%p2524_p4), [#allocation7], 4294966272 }
  0xa2   : > { %2020 = dma.done.wait (%p2524_p4), [#allocation10], 1024  }
  0xa3   : > { %2022 = vsyncadd (%p2524_p4), [#allocation10], 4294966272  ;;  %vm371_vm0 = vcmask 261120   ;;  %v2058_v0 = vmov 0.0|0.0   ;;  %v2059_v1 = vmov 0.0   ;;  %vm2060_vm1 = vmmov 0  }
  0xa4   : > { %1663 = vmatprep.subr.bf16.mxu0 %v2058_v0  ;;  %1669 = vmatprep.subr.bf16.mxu1 %v2058_v0  ;;  %372 = vst.msk [vmem:[#allocation2] sm:$0xff] %vm371_vm0, %v2059_v1  ;;  %v374_v2 = vld [vmem:[#allocation6] sm:$0xff]  ;;  %v375_v3 = vld [vmem:[#allocation6 + $0x8] sm:$0xff]  ;;  %v376_v7 = vld [vmem:[#allocation6 + $0x10] sm:$0xff]  ;;  %vm600_vm2 = vcmask 64512   ;;  %s2061_s28 = smov 120  }
  0xa5   : > { %1587 = vmatprep.mubr.msk.f32.mxu0 %vm2060_vm1, %v2059_v1  ;;  %1598 = vmatprep.mubr.msk.f32.mxu1 %vm2060_vm1, %v2059_v1  ;;  %v452_v4 = vld [vmem:[#allocation8] sm:$0xff]  ;;  %v1664_v5 = vpack.c.bf16 %v375_v3, %v374_v2  ;;  %v453_v6 = vld [vmem:[#allocation8 + $0x8] sm:$0xff]  ;;  %v377_v8 = vld [vmem:[#allocation6 + $0x18] sm:$0xff]  ;;  %s2062_s29 = smov 112   ;;  %s2063_s14 = smov 104   ;;  %vm1270_vm3 = vcmask 130048  }
  0xa6   : > { %v1670_v9 = vpack.c.bf16 %v453_v6, %v452_v4  ;;  %v454_v10 = vld [vmem:[#allocation8 + $0x10] sm:$0xff]  ;;  %v455_v11 = vld [vmem:[#allocation8 + $0x18] sm:$0xff]  ;;  %v1667_v12 = vpack.c.bf16 %v377_v8, %v376_v7  ;;  %v526_v15 = vld [vmem:[#allocation9] sm:$0xff]  ;;  %s2064_s27 = smov 8   ;;  %s2065_s13 = smov 16   ;;  %vm1272_vm4 = vcmask 195584  }
  0xa7   : > { %1665 = vmatpush3.bf16.msra.mxu0 %v1664_v5  ;;  %v1673_v13 = vpack.c.bf16 %v455_v11, %v454_v10  ;;  %v373_v14 = vld [vmem:[%s2347_s10] sm:$0xff]  ;;  %v527_v16 = vld [vmem:[#allocation9 + $0x8] sm:$0xff]  ;;  %s2066_s9 = smov 24   ;;  %s1540_s8 = sshll.u32 %s2041_s24, 7 }
  0xa8   : > { %1671 = vmatpush3.bf16.msra.mxu1 %v1670_v9  ;;  %1666 = vmatprep.subr.bf16.mxu0 %v2058_v0  ;;  %v528_v17 = vld [vmem:[#allocation9 + $0x10] sm:$0xff]  ;;  %v1676_v18 = vpack.c.bf16 %v527_v16, %v526_v15  ;;  %v529_v19 = vld [vmem:[#allocation9 + $0x18] sm:$0xff]  ;;  %v1275_v9 = vld [vmem:[#allocation11] sm:$0xff]  ;;  %s365_s30 = scalar_lea.vmem [#allocation12], %s1516_s15  ;;  %p2525_p9 = scmp.ne.s32.totalorder %s2520_s16, 0 }
  0xa9   : > { %1672 = vmatprep.subr.bf16.mxu1 %v2058_v0  ;;  %v1679_v20 = vpack.c.bf16 %v529_v19, %v528_v17  ;;  %v1276_v10 = vld [vmem:[#allocation11 + $0x8] sm:$0xff]  ;;  %s1381_s7 = sshll.u32 %s365_s30, 4  ;;  %s2067_s24 = smov [#allocation12]   ;;  %s2450_s7 = int_to_ptr.vmem [resolvable:$true] %s1381_s7 }
  0xaa   : > { %s1963_s15 = sshll.u32 %s2067_s24, 4  ;;  %s1964_s15 = int_to_ptr.vmem [resolvable:$false] %s1963_s15 }
  0xab   : > { %1668 = vmatpush3.bf16.msra.mxu0 %v1667_v12  ;;  %v1682_v12 = vpack.c.bf16 %v1276_v10, %v1275_v9  ;;  %p1966_p0 = scmp.lt.s32.totalorder %s2450_s7, %s1964_s15 }
  0xac   : > { %1674 = vmatpush3.bf16.msra.mxu1 %v1673_v13  ;;  %1675 = vmatprep.subr.bf16.mxu0 %v2058_v0  ;;  %v1277_v13 = vld [vmem:[#allocation11 + $0x10] sm:$0xff] }
  0xad   : > { %1612 = vmatprep.subr.mxu1 %v2059_v1 }
  0xae   : > { %1588 = vmatmul.mubr.msk.f32.vlgmr.msra.gmra.mrb[0].mxu0 %vm371_vm0, %v373_v14 }
  0xaf   : > { %1599 = vmatmul.mubr.msk.f32.vlgmr.msra.gmra.mrb[0].mxu1 %vm371_vm0, %v373_v14  ;;  %1609 = vmatprep.mubr.msk.f32.mxu0 %vm2060_vm1, %v2059_v1 }
  0xb0   : > { %1614 = vmatprep.mubr.msk.f32.mxu1 %vm2060_vm1, %v2059_v1  ;;  %1677 = vmatpush3.bf16.msra.mxu0 %v1676_v18 }
  0xb1   : > { %1678 = vmatprep.subr.bf16.mxu0 %v2058_v0 }
  0xb4   : > { %1680 = vmatpush3.bf16.msra.mxu0 %v1679_v20 }
  0xb5   : > { %1632 = vmatprep.subr.mxu0 %v2059_v1 }
  0xb7   : > { %1610 = vmatmul.mubr.msk.f32.vlgmr.msra.gmra.mrb[2].mxu0 %vm371_vm0, %v373_v14  ;;  %v1278_v14 = vld [vmem:[#allocation11 + $0x18] sm:$0xff] }
  0xb8   : > { %1634 = vmatprep.mubr.msk.f32.mxu0 %vm2060_vm1, %v2059_v1  ;;  %v1685_v16 = vpack.c.bf16 %v1278_v14, %v1277_v13 }
 0x181   : > { %v448_v21 = vpop.f32.mrb[0].mxu0 }
 0x182   : > { %v522_v22 = vpop.f32.mrb[0].mxu1  ;;  %761 = vrot.lane.b32.xlu1 %v448_v21, %s2061_s28  ;;  %v1589_v23 = vpop.f32.mrb[1].mxu0 }
 0x183   : > { %v1600_v24 = vpop.f32.mrb[1].mxu1  ;;  %1613 = vmatpush3.xpose.msk.msra.mxu1 %vm600_vm2, %v522_v22 }
 0x184   : > { %1617 = vmatprep.subr.mxu1 %v2059_v1 }
 0x186   : > { %1615 = vmatmul.mubr.msk.f32.vlgmr.msra.gmra.mrb[2].mxu1 %vm600_vm2, %v448_v21  ;;  %929 = vrot.lane.b32.xlu1 %v522_v22, %s2062_s29 }
 0x187   : > { %1619 = vmatprep.mubr.msk.f32.mxu1 %vm2060_vm1, %v2059_v1 }
 0x18a   : > { %927 = vrot.lane.b32.xlu1 %v448_v21, %s2062_s29  ;;  %v596_v25 = vpop.f32.mrb[2].mxu0 }
 0x18b   : > { %v1611_v26 = vpop.f32.mrb[3].mxu0  ;;  %1618 = vmatpush3.msra.mxu1 %v596_v25 }
 0x18c   : > { %1622 = vmatprep.subr.mxu1 %v2059_v1 }
 0x18e   : > { %1094 = vrot.lane.b32.xlu1 %v522_v22, %s2063_s14 }
 0x192   : > { %1092 = vrot.lane.b32.xlu1 %v448_v21, %s2063_s14 }
 0x196   : > { %1014 = vrot.lane.b32.xlu1 %v596_v25, %s2062_s29  ;;  %s1368_s29 = scalar_lea.sflag [#allocation5], %s2341_s1 }
 0x1f4   : > { %v762_v27 = vpop.permute.xlu1 %761 }
 0x1f8   : > { %v930_v28 = vpop.permute.xlu1 %929 }
 0x1f9   : > { %1633 = vmatpush3.xpose.msk.msra.mxu0 %vm600_vm2, %v930_v28 }
 0x1fa   : > { %1642 = vmatprep.subr.mxu0 %v2059_v1 }
 0x1fc   : > { %v928_v29 = vpop.permute.xlu1 %927 }
 0x1fd   : > { %1635 = vmatmul.mubr.msk.f32.vlgmr.msra.gmra.mrb[4].mxu0 %vm600_vm2, %v928_v29 }
 0x1fe   : > { %1644 = vmatprep.mubr.msk.f32.mxu0 %vm2060_vm1, %v2059_v1 }
 0x200   : > { %v1095_v30 = vpop.permute.xlu1 %1094 }
 0x201   : > { %1643 = vmatpush3.xpose.msk.msra.mxu0 %vm600_vm2, %v1095_v30 }
 0x202   : > { %1681 = vmatprep.subr.bf16.mxu0 %v2058_v0 }
 0x204   : > { %v1093_v31 = vpop.permute.xlu1 %1092 }
 0x205   : > { %1645 = vmatmul.mubr.msk.f32.vlgmr.msra.gmra.mrb[6].mxu0 %vm600_vm2, %v1093_v31 }
 0x206   : > { %1660 = vmatprep.mubr.msk.f32.mxu0 %vm2060_vm1, %v2059_v1  ;;  %1683 = vmatpush3.bf16.msra.mxu0 %v1682_v12 }
 0x207   : > { %1684 = vmatprep.subr.bf16.mxu0 %v2058_v0 }
 0x208   : > { %v1015_v57 = vpop.permute.xlu1 %1014 }
 0x20a   : > { %1686 = vmatpush3.bf16.msra.mxu0 %v1685_v16 }
 0x259   : > { %v673_v32 = vpop.f32.mrb[2].mxu1 }
 0x25a   : > { %v1616_v33 = vpop.f32.mrb[3].mxu1  ;;  %v677_v34 = vsel %vm600_vm2, %v673_v32, -inf }
 0x25b   : > { %678 = vmax.xlane.f32.xlu0 %v677_v34 }
 0x271   : > { %763 = vrot.lane.b32.xlu0 %v522_v22, %s2061_s28 }
 0x2d0   : > { %v1001_v35 = vpop.f32.mrb[4].mxu0 }
 0x2d1   : > { %v1636_v36 = vpop.f32.mrb[5].mxu0  ;;  %v1005_v37 = vsel %vm600_vm2, %v1001_v35, -inf }
 0x2d2   : > { %1006 = vmax.xlane.f32.xlu0 %v1005_v37  ;;  %v1274_v36 = vld [vmem:[#allocation2] sm:$0xff] }
 0x2d8   : > { %v1166_v38 = vpop.f32.mrb[6].mxu0 }
 0x2d9   : > { %v1646_v39 = vpop.f32.mrb[7].mxu0  ;;  %v1170_v40 = vsel %vm600_vm2, %v1166_v38, -inf }
 0x2da   : > { %1171 = vmax.xlane.f32.xlu1 %v1170_v40  ;;  %v1538_v40 = vld [vmem:[%s2503_s5] ss:$0 sm:$0xff] }
 0x2e8   : > { %v679_v41 = vpop.xlane.xlu0 %678  ;;  %849 = vrot.lane.b32.xlu0 %v596_v25, %s2061_s28  ;;  %s2448_s28 = scalar_lea.hbm %s2504_s6, %s1540_s8 }
 0x2e9   : > { %v680_v42 = vsub.f32 %v673_v32, %v679_v41 }
 0x2eb   : > { %v681_v43 = vmul.f32 1.442695, %v680_v42 }
 0x2ec   : > { %v764_v45 = vpop.permute.xlu0 %763 }
 0x2ed   : > { %1801 = vpow2.f32 %v681_v43 }
 0x2f7   : > { %v1802_v44 = vpop.eup %1801 }
 0x2f8   : > { %1620 = vmatmul.mubr.msk.f32.vlgmr.msra.gmra.mrb[4].mxu1 %vm600_vm2, %v1802_v44  ;;  %v683_v7 = vsel %vm600_vm2, %v1802_v44, 0.0 }
 0x2f9   : > { %1623 = vmatpush3.xpose.msk.msra.mxu1 %vm600_vm2, %v764_v45  ;;  %1624 = vmatprep.mubr.msk.f32.mxu1 %vm2060_vm1, %v2059_v1 }
 0x2fa   : > { %1627 = vmatprep.subr.mxu1 %v2059_v1 }
 0x2fc   : > { %1625 = vmatmul.mubr.msk.f32.vlgmr.msra.gmra.mrb[6].mxu1 %vm600_vm2, %v762_v27 }
 0x2fd   : > { %1629 = vmatprep.mubr.msk.f32.mxu1 %vm2060_vm1, %v2059_v1 }
 0x35f   : > { %v1007_v46 = vpop.xlane.xlu0 %1006 }
 0x360   : > { %v1008_v47 = vsub.f32 %v1001_v35, %v1007_v46 }
 0x362   : > { %v1009_v54 = vmul.f32 1.442695, %v1008_v47 }
 0x363   : > { %v850_v48 = vpop.permute.xlu0 %849 }
 0x364   : > { %1628 = vmatpush3.msra.mxu1 %v850_v48  ;;  %1803 = vpow2.f32 %v1009_v54 }
 0x365   : > { %1637 = vmatprep.subr.mxu1 %v2059_v1 }
 0x367   : > { %v1172_v58 = vpop.xlane.xlu1 %1171 }
 0x368   : > { %v1173_v59 = vsub.f32 %v1166_v38, %v1172_v58 }
 0x36a   : > { %v1174_v62 = vmul.f32 1.442695, %v1173_v59 }
 0x36e   : > { %v1804_v55 = vpop.eup %1803 }
 0x36f   : > { %v1011_v56 = vsel %vm600_vm2, %v1804_v55, 0.0 }
 0x3cb   : > { %v2418_v49 = vpop.f32.mrb[4].mxu1 }
 0x3cc   : > { %v1621_v50 = vpop.f32.mrb[5].mxu1 }
 0x3cf   : > { %v835_v51 = vpop.f32.mrb[6].mxu1 }
 0x3d0   : > { %v1626_v52 = vpop.f32.mrb[7].mxu1  ;;  %v839_v53 = vsel %vm600_vm2, %v835_v51, -inf }
 0x3d1   : > { %840 = vmax.xlane.f32.xlu1 %v839_v53 }
 0x3e2   : > { %1179 = vrot.lane.b32.xlu1 %v596_v25, %s2063_s14  ;;  %s1959_s14 = scalar_lea.vmem %s2450_s7, 128 }
 0x3e3   : > { %p1960_p2 = scmp.ne.s32.totalorder %s2450_s7, %s1959_s14 }
 0x3e5   : > { %p1961_p10 = pnand %p1960_p2, %p2525_p9 }
 0x3e7   : > { %p1962_p1 = pneg %p1961_p10 }
 0x406   : > { %1012 = vadd.xlane.f32.xlu1 %v1011_v56 }
 0x45e   : > { %v841_v60 = vpop.xlane.xlu1 %840 }
 0x45f   : > { %v842_v61 = vsub.f32 %v835_v51, %v841_v60 }
 0x461   : > { %v843_v63 = vmul.f32 1.442695, %v842_v61 }
 0x462   : > { %v1180_v5 = vpop.permute.xlu1 %1179 }
 0x463   : > { %1805 = vpow2.f32 %v843_v63 }
 0x464   : > { %1807 = vpow2.f32 %v1174_v62 }
 0x46d   : > { %v1806_v2 = vpop.eup %1805 }
 0x46e   : > { %1630 = vmatmul.mubr.msk.f32.vlgmr.msra.gmra.mrb[8].mxu1 %vm600_vm2, %v1806_v2  ;;  %v845_v3 = vsel %vm600_vm2, %v1806_v2, 0.0  ;;  %v1808_v4 = vpop.eup %1807 }
 0x46f   : > { %1638 = vmatpush3.msra.mxu1 %v1015_v57  ;;  %846 = vadd.xlane.f32.xlu0 %v845_v3  ;;  %v1176_v6 = vsel %vm600_vm2, %v1808_v4, 0.0 }
 0x470   : > { %1639 = vmatprep.mubr.msk.f32.mxu1 %vm2060_vm1, %v2059_v1  ;;  %1647 = vmatprep.subr.mxu1 %v2059_v1 }
 0x472   : > { %1640 = vmatmul.mubr.msk.f32.vlgmr.msra.gmra.mrb[10].mxu1 %vm600_vm2, %v1804_v55 }
 0x473   : > { %1648 = vmatpush3.msra.mxu1 %v1180_v5  ;;  %1177 = vadd.xlane.f32.xlu0 %v1176_v6 }
 0x474   : > { %1649 = vmatprep.mubr.msk.f32.mxu1 %vm2060_vm1, %v2059_v1 }
 0x476   : > { %1650 = vmatmul.mubr.msk.f32.vlgmr.msra.gmra.mrb[12].mxu1 %vm600_vm2, %v1808_v4 }
 0x477   : > { %684 = vadd.xlane.f32.xlu0 %v683_v7 }
 0x493   : > { %v1013_v11 = vpop.xlane.xlu1 %1012 }
 0x4fc   : > { %v847_v8 = vpop.xlane.xlu0 %846 }
 0x4fd   : > { %1809 = vrcp.f32 %v847_v8 }
 0x4fe   : > { %1811 = vrcp.f32 %v1013_v11 }
 0x500   : > { %v1178_v15 = vpop.xlane.xlu0 %1177 }
 0x501   : > { %1813 = vrcp.f32 %v1178_v15 }
 0x504   : > { %v685_v27 = vpop.xlane.xlu0 %684 }
 0x505   : > { %1815 = vrcp.f32 %v685_v27 }
 0x507   : > { %v1810_v1 = vpop.eup %1809 }
 0x508   : > { %v1812_v20 = vpop.eup %1811 }
 0x50b   : > { %v1814_v24 = vpop.eup %1813 }
 0x50f   : > { %v1816_v28 = vpop.eup %1815 }
 0x510   : > { %v760_v30 = vmul.f32 %v1816_v28, %v2418_v49 }
 0x541   : > { %v921_v17 = vpop.f32.mrb[8].mxu1 }
 0x542   : > { %v926_v18 = vmul.f32 %v1810_v1, %v921_v17  ;;  %v1631_v19 = vpop.f32.mrb[9].mxu1 }
 0x544   : > { %1258 = vrot.lane.b32.xlu1 %v926_v18, %s2064_s27  ;;  %s1965_s27 = scalar_lea.vmem %s1964_s15, 256 }
 0x545   : > { %v1086_v21 = vpop.f32.mrb[10].mxu1  ;;  %p1967_p7 = scmp.lt.s32.totalorder %s1965_s27, %s1959_s14 }
 0x546   : > { %v1091_v22 = vmul.f32 %v1812_v20, %v1086_v21  ;;  %v1641_v23 = vpop.f32.mrb[11].mxu1 }
 0x547   : > { %p1968_p5 = por %p1967_p7, %p1966_p0 }
 0x548   : > { %1262 = vrot.lane.b32.xlu0 %v1091_v22, %s2065_s13 }
 0x549   : > { %v1251_v0 = vpop.f32.mrb[12].mxu1  ;;  %p1969_p8 = pnand %p1968_p5, %p1962_p1 }
 0x54a   : > { %v1256_v25 = vmul.f32 %v1814_v24, %v1251_v0  ;;  %v1651_v26 = vpop.f32.mrb[13].mxu1 }
 0x54c   : > { %1266 = vrot.lane.b32.xlu1 %v1256_v25, %s2066_s9 }
 0x5b6   : > { %v1259_v29 = vpop.permute.xlu1 %1258 }
 0x5b7   : > { %v1269_v32 = vsel %vm600_vm2, %v760_v30, %v1259_v29 }
 0x5ba   : > { %v1263_v31 = vpop.permute.xlu0 %1262 }
 0x5bb   : > { %v1271_v33 = vsel %vm1270_vm3, %v1269_v32, %v1263_v31 }
 0x5be   : > { %v1267_v34 = vpop.permute.xlu1 %1266 }
 0x5bf   : > { %v1273_v35 = vsel %vm1272_vm4, %v1271_v33, %v1267_v34 }
 0x5c0   : > { %1661 = vmatmul.mubr.msk.f32.vlgmr.msra.gmra.mrb[8].mxu0 %vm371_vm0, %v1273_v35 }
 0x693   : > { %v1348_v37 = vpop.f32.mrb[8].mxu0 }
 0x694   : > { %v1352_v38 = vadd.f32 %v1348_v37, %v1274_v36  ;;  %v1662_v39 = vpop.f32.mrb[9].mxu0 }
 0x696   : > { %1353 = vst.msk [vmem:[#allocation2] sm:$0xff] %vm371_vm0, %v1352_v38 }
 0x69d   : > { %v1357_v41 = vld [vmem:[#allocation2] sm:$0xff] }
 0x69e   : > { %v1365_v42 = vadd.f32 %v1538_v40, %v1357_v41 }
 0x6a0   : > { %1366 = vst.msk [vmem:[%s365_s30] sm:$0xff] %vm371_vm0, %v1365_v42 }
 0x6a1   : > { %1972 = shalt.err (!%p1969_p8)
}
 0x6a2   : > { %s1973_s1 = scalar_lea.hbm %s2448_s28, 128  ;;  %s1977_s11 = scalar_lea.hbm %s2504_s6, 256 }
 0x6a3   : > { %p1974_p3 = scmp.ne.s32.totalorder %s2448_s28, %s1973_s1  ;;  %p1978_p13 = scmp.lt.u32.totalorder %s2448_s28, %s2504_s6 }
 0x6a4   : > { %p1979_p12 = scmp.lt.u32.totalorder %s1977_s11, %s1973_s1  ;;  %p1981_p2 = scmp.lt.u32.totalorder %s1973_s1, %s2448_s28 }
 0x6a5   : > { %p1975_p11 = pnand %p1974_p3, %p2525_p9 }
 0x6a6   : > { %p1980_p4 = por %p1979_p12, %p1978_p13 }
 0x6a7   : > { %p1976_p6 = pneg %p1975_p11 }
 0x6a8   : > { %p1982_p10 = por %p1981_p2, %p1980_p4 }
 0x6aa   : > { %p1983_p1 = pnand %p1982_p10, %p1976_p6 }
 0x6ac   : > { %1986 = shalt.err (!%p1983_p1)
}
 0x6ad   : > { %1705 = dma.vmem_to_hbm [thread:$0]  (%p2525_p9), %s2450_s7, 128, %s2448_s28, %s1368_s29  }
 0x6ae PF: > { %s1393_s30 = sand.u32 1, %s2029_s21   ;;  %p2526_p0 = scmp.ne.s32.totalorder %s2521_s19, 0 }
 0x6af   : > { %p2527_p7 = scmp.ge.s32.totalorder %s2049_s26, 2  ;;  %s1394_s12 = scalar_lea.sflag [#allocation5], %s1393_s30 }
 0x6b1   : > { %p1725_p5 = pnand %p2527_p7, %p2526_p0 }
 0x6b3   : > { %2024 = dma.done.wait (!%p1725_p5), %s1394_s12, 128  }
 0x6b4   : > { %2026 = vsyncadd (!%p1725_p5), %s1394_s12, 4294967168  ;;  %s24_s26 = sadd.s32 1, %s2049_s26   ;;  %s2528_s21 = smov %s2033_s22 }
 0x6b5   : > { %p21_p8 = scmp.ge.s32.totalorder %s24_s26, 4   ;;  %s2529_s22 = smov %s2037_s23 }
 0x6b6   : > { %s2530_s23 = smov %s2291_s17  ;;  %s2531_s24 = smov %s2045_s25 }
 0x6b7   : > { %s2532_s25 = smov %s2534_s18  ;;  %23 = sbr.rel (!%p21_p8) target bundleno = 10 (0xa), region = 117 }
 0x6be   :  { %1399 = vsyncpa [#allocation4], 1 }
 0x6bf   :  { %1401 = vsyncpa [#allocation4 + $0x1], 1 }
 0x6c0   :  { %1402 = vsyncpa [#allocation7], 1 }
 0x6c1   :  { %1403 = vsyncpa [#allocation10], 1 }
 0x6c2   :  { %1404 = vsyncpa [#allocation5], 1 }
 0x6c3   :  { %1406 = vsyncpa [#allocation5 + $0x1], 1 }

</bundles_post_ra>
